<compile_context>
chip_gen: v5e
topology: v5e:2x2
jax: 0.10.0
libtpu: 0.0.40
codegen_flags: <defaults>
</compile_context>

<pallas_src>
import functools
import math

import jax
import jax.numpy as jnp
from jax import lax
from jax.experimental import pallas as pl
from jax.experimental.pallas import tpu as pltpu


def _attention_kernel(xq_ref, xkv_ref, w_ref, b_ref, out_ref, attn_ref, *,
                      dm, fused):
    # xq_ref : (1, TQ, Din) bf16   -- query rows for this grid step
    # xkv_ref: (1, S,  Din) bf16   -- full sequence (for K/V when TQ < S)
    # w_ref  : (Din, 3*Dm) bf16    -- fused [Wq | Wk | Wv]
    # b_ref  : (1, 3*Dm)  f32      -- fused [bq | bk | bv]
    xq = xq_ref[0]                                        # (TQ, Din)

    if fused:
        # One wide MXU matmul producing Q, K, V together (TQ == S here).
        qkv = jnp.dot(xq, w_ref[...],
                      preferred_element_type=jnp.float32) + b_ref[...]
        q = qkv[:, :dm]
        k = qkv[:, dm:2 * dm]
        v = qkv[:, 2 * dm:]
    else:
        # Query tile projected alone; K/V projected fused over the full S.
        xkv = xkv_ref[0]                                  # (S, Din)
        q = jnp.dot(xq, w_ref[:, :dm],
                    preferred_element_type=jnp.float32) + b_ref[:, :dm]
        kv = jnp.dot(xkv, w_ref[:, dm:],
                     preferred_element_type=jnp.float32) + b_ref[:, dm:]
        k = kv[:, :dm]
        v = kv[:, dm:]

    # Fold the 1/sqrt(d_k) scale into q (TQ*Dm elems, not TQ*S).
    q = q * (1.0 / math.sqrt(dm))

    # q @ k^T without materializing a transpose of k: contract last axes.
    scores = lax.dot_general(
        q.astype(jnp.bfloat16), k.astype(jnp.bfloat16),
        dimension_numbers=(((1,), (1,)), ((), ())),
        preferred_element_type=jnp.float32)               # (TQ, S)

    # numerically-stable softmax over the last axis
    scores = scores - jnp.max(scores, axis=-1, keepdims=True)
    p = jnp.exp(scores)
    attn = p * pl.reciprocal(jnp.sum(p, axis=-1, keepdims=True), approx=True)

    out = jnp.dot(attn.astype(jnp.bfloat16), v.astype(jnp.bfloat16),
                  preferred_element_type=jnp.float32)     # (TQ, Dm)
    out_ref[0] = out.astype(out_ref.dtype)
    attn_ref[0] = attn.astype(attn_ref.dtype)


def parametric_attention(x, wq, wk, wv, bq, bk, bv):
    """x: (B, S, Din); w*: (Din, Dm); b*: (1, Dm).  Returns (out, attn_weights)."""
    B, S, Din = x.shape
    Dm = wq.shape[1]

    # Query-tile size: full S for small sequences, else 512 rows per step
    # (2 * TQ * S * 4B double-buffered attn output stays within v7x's 64 MiB).
    TQ = S if S <= 512 else 512
    assert S % TQ == 0, "sequence length must be a multiple of the query tile"
    n_q = S // TQ
    fused = (n_q == 1)

    # bf16 matmul inputs (f32 accumulation inside the kernel); halves the
    # x / weight HBM->VMEM traffic.  Biases stay f32 (added post-accumulation).
    x_bf = x.astype(jnp.bfloat16)
    w_qkv = jnp.concatenate([wq, wk, wv], axis=1).astype(jnp.bfloat16)
    b_qkv = jnp.concatenate([bq, bk, bv], axis=1)

    kernel = functools.partial(_attention_kernel, dm=Dm, fused=fused)

    out, attn = pl.pallas_call(
        kernel,
        out_shape=(
            jax.ShapeDtypeStruct((B, S, Dm), jnp.float32),
            jax.ShapeDtypeStruct((B, S, S), jnp.float32),
        ),
        grid_spec=pltpu.PrefetchScalarGridSpec(
            num_scalar_prefetch=0,
            grid=(B, n_q),
            in_specs=[
                pl.BlockSpec((1, TQ, Din), lambda b, q: (b, q, 0)),   # query rows
                pl.BlockSpec((1, S, Din), lambda b, q: (b, 0, 0)),    # full seq (K/V)
                pl.BlockSpec((Din, 3 * Dm), lambda b, q: (0, 0)),     # fused weights
                pl.BlockSpec((1, 3 * Dm), lambda b, q: (0, 0)),       # fused biases
            ],
            out_specs=[
                pl.BlockSpec((1, TQ, Dm), lambda b, q: (b, q, 0)),
                pl.BlockSpec((1, TQ, S), lambda b, q: (b, q, 0)),
            ],
        ),
        compiler_params=pltpu.CompilerParams(
            # no reduction axis -> both grid axes are parallel (megacore/v7x).
            dimension_semantics=("parallel", "parallel"),
            vmem_limit_bytes=48 * 1024 * 1024),
    )(x_bf, x_bf, w_qkv, b_qkv)
    return out, attn


def _init_linear(key, in_dim, out_dim):
    # Deterministic init mimicking nn.Linear (uniform in +/- 1/sqrt(in_dim)).
    k_w, k_b = jax.random.split(key)
    bound = 1.0 / math.sqrt(in_dim)
    # stored pre-transposed: (in_dim, out_dim)
    w = jax.random.uniform(k_w, (in_dim, out_dim), jnp.float32, -bound, bound)
    b = jax.random.uniform(k_b, (1, out_dim), jnp.float32, -bound, bound)
    return w, b


def _reference(x, wq, wk, wv, bq, bk, bv):
    q = x @ wq + bq
    k = x @ wk + bk
    v = x @ wv + bv
    d_k = q.shape[-1]
    attn = jnp.einsum("bqd,bkd->bqk", q, k) / math.sqrt(d_k)
    attn_w = jax.nn.softmax(attn, axis=-1)
    return jnp.einsum("bqk,bkd->bqd", attn_w, v), attn_w


if __name__ == "__main__":
    B, S, Din, Dm = 2, 8, 32, 32
    key = jax.random.PRNGKey(0)
    kx, kq, kk, kv = jax.random.split(key, 4)

    x = jax.random.normal(kx, (B, S, Din), jnp.float32)
    wq, bq = _init_linear(kq, Din, Dm)
    wk, bk = _init_linear(kk, Din, Dm)
    wv, bv = _init_linear(kv, Din, Dm)
    # TODO(synk): dropout is a no-op in eval / when dropout=None, so it is omitted.

    out, attn_w = parametric_attention(x, wq, wk, wv, bq, bk, bv)
    jax.block_until_ready((out, attn_w))

    ref_out, ref_attn = _reference(x, wq, wk, wv, bq, bk, bv)
    # tolerance relaxed for bf16 matmul inputs + approx reciprocal
    assert jnp.allclose(out, ref_out, atol=2e-2, rtol=2e-2), "output mismatch"
    assert jnp.allclose(attn_w, ref_attn, atol=2e-2, rtol=2e-2), "attn mismatch"

    print("KERNEL_OK")
</pallas_src>

<mosaic_0001>
module attributes {stable_mosaic.version = 11 : i64} {
  func.func @_attention_kernel(%arg0: i32, %arg1: i32, %arg2: memref<1x8x32xbf16, #tpu.memory_space<vmem>>, %arg3: memref<1x8x32xbf16, #tpu.memory_space<vmem>>, %arg4: memref<32x96xbf16, #tpu.memory_space<vmem>>, %arg5: memref<1x96xf32, #tpu.memory_space<vmem>>, %arg6: memref<1x8x32xf32, #tpu.memory_space<vmem>>, %arg7: memref<1x8x8xf32, #tpu.memory_space<vmem>>) attributes {dimension_semantics = [#tpu.dimension_semantics<parallel>, #tpu.dimension_semantics<parallel>], iteration_bounds = array<i64: 2, 1>, scalar_prefetch = 0 : i64, scratch_operands = 0 : i64, tpu.core_type = #tpu.core_type<tc>, window_params = [{transform_indices = @transform_0, window_bounds = array<i64: 1, 8, 32>}, {transform_indices = @transform_1, window_bounds = array<i64: 1, 8, 32>}, {pipeline_mode = #tpu.pipeline_mode<synchronous>, transform_indices = @transform_2, window_bounds = array<i64: 32, 96>}, {pipeline_mode = #tpu.pipeline_mode<synchronous>, transform_indices = @transform_3, window_bounds = array<i64: 1, 96>}, {transform_indices = @transform_4, window_bounds = array<i64: 1, 8, 32>}, {transform_indices = @transform_5, window_bounds = array<i64: 1, 8, 8>}]} {
    %c0 = arith.constant 0 : index
    %c0_0 = arith.constant 0 : index
    %c0_1 = arith.constant 0 : index
    %0 = vector.load %arg2[%c0, %c0_0, %c0_1] : memref<1x8x32xbf16, #tpu.memory_space<vmem>>, vector<1x8x32xbf16>
    %1 = vector.shape_cast %0 : vector<1x8x32xbf16> to vector<8x32xbf16>
    %c0_2 = arith.constant 0 : index
    %c0_3 = arith.constant 0 : index
    %2 = vector.load %arg4[%c0_2, %c0_3] : memref<32x96xbf16, #tpu.memory_space<vmem>>, vector<32x96xbf16>
    %cst = arith.constant dense<0.000000e+00> : vector<8x96xf32>
    %3 = tpu.matmul %1, %2, %cst {dimension_numbers = #tpu.dot_dimension_numbers<[1], [0], [0], [1], [0, 0, 1, 1], [], []>} : vector<8x32xbf16>, vector<32x96xbf16>, vector<8x96xf32> -> vector<8x96xf32>
    %c0_4 = arith.constant 0 : index
    %c0_5 = arith.constant 0 : index
    %4 = vector.load %arg5[%c0_4, %c0_5] : memref<1x96xf32, #tpu.memory_space<vmem>>, vector<1x96xf32>
    %5 = vector.broadcast %4 : vector<1x96xf32> to vector<8x96xf32>
    %6 = arith.addf %3, %5 : vector<8x96xf32>
    %7 = vector.extract_strided_slice %6 {offsets = [0, 0], sizes = [8, 32], strides = [1, 1]} : vector<8x96xf32> to vector<8x32xf32>
    %8 = vector.extract_strided_slice %6 {offsets = [0, 32], sizes = [8, 32], strides = [1, 1]} : vector<8x96xf32> to vector<8x32xf32>
    %9 = vector.extract_strided_slice %6 {offsets = [0, 64], sizes = [8, 32], strides = [1, 1]} : vector<8x96xf32> to vector<8x32xf32>
    %cst_6 = arith.constant 0.176776692 : f32
    %10 = vector.broadcast %cst_6 : f32 to vector<8x32xf32>
    %11 = arith.mulf %7, %10 : vector<8x32xf32>
    %12 = arith.truncf %11 : vector<8x32xf32> to vector<8x32xbf16>
    %13 = arith.truncf %8 : vector<8x32xf32> to vector<8x32xbf16>
    %cst_7 = arith.constant dense<0.000000e+00> : vector<8x8xf32>
    %14 = tpu.matmul %12, %13, %cst_7 {dimension_numbers = #tpu.dot_dimension_numbers<[1], [1], [0], [0], [0, 0, 1, 0], [], []>} : vector<8x32xbf16>, vector<8x32xbf16>, vector<8x8xf32> -> vector<8x8xf32>
    %cst_8 = arith.constant dense<0xFF800000> : vector<8xf32>
    %15 = vector.multi_reduction <maximumf>, %14, %cst_8 [1] : vector<8x8xf32> to vector<8xf32>
    %16 = vector.shape_cast %15 : vector<8xf32> to vector<8x1xf32>
    %17 = vector.broadcast %16 : vector<8x1xf32> to vector<8x8xf32>
    %18 = arith.subf %14, %17 : vector<8x8xf32>
    %19 = math.exp %18 : vector<8x8xf32>
    %cst_9 = arith.constant dense<0.000000e+00> : vector<8xf32>
    %20 = vector.multi_reduction <add>, %19, %cst_9 [1] : vector<8x8xf32> to vector<8xf32>
    %21 = vector.shape_cast %20 : vector<8xf32> to vector<8x1xf32>
    %22 = tpu.reciprocal %21 {approx = true} : vector<8x1xf32> -> vector<8x1xf32>
    %23 = vector.broadcast %22 : vector<8x1xf32> to vector<8x8xf32>
    %24 = arith.mulf %19, %23 : vector<8x8xf32>
    %25 = arith.truncf %24 : vector<8x8xf32> to vector<8x8xbf16>
    %26 = arith.truncf %9 : vector<8x32xf32> to vector<8x32xbf16>
    %cst_10 = arith.constant dense<0.000000e+00> : vector<8x32xf32>
    %27 = tpu.matmul %25, %26, %cst_10 {dimension_numbers = #tpu.dot_dimension_numbers<[1], [0], [0], [1], [0, 0, 1, 1], [], []>} : vector<8x8xbf16>, vector<8x32xbf16>, vector<8x32xf32> -> vector<8x32xf32>
    %c0_11 = arith.constant 0 : index
    %c0_12 = arith.constant 0 : index
    %c0_13 = arith.constant 0 : index
    %28 = vector.load %arg6[%c0_11, %c0_12, %c0_13] : memref<1x8x32xf32, #tpu.memory_space<vmem>>, vector<1x8x32xf32>
    %29 = vector.shape_cast %28 : vector<1x8x32xf32> to vector<8x32xf32>
    %30 = vector.shape_cast %27 : vector<8x32xf32> to vector<1x8x32xf32>
    tpu.vector_store %arg6[%c0_11, %c0_12, %c0_13], %30 {strides = array<i32>} : memref<1x8x32xf32, #tpu.memory_space<vmem>>, vector<1x8x32xf32>,
    %c0_14 = arith.constant 0 : index
    %c0_15 = arith.constant 0 : index
    %c0_16 = arith.constant 0 : index
    %31 = vector.load %arg7[%c0_14, %c0_15, %c0_16] : memref<1x8x8xf32, #tpu.memory_space<vmem>>, vector<1x8x8xf32>
    %32 = vector.shape_cast %31 : vector<1x8x8xf32> to vector<8x8xf32>
    %33 = vector.shape_cast %24 : vector<8x8xf32> to vector<1x8x8xf32>
    tpu.vector_store %arg7[%c0_14, %c0_15, %c0_16], %33 {strides = array<i32>} : memref<1x8x8xf32, #tpu.memory_space<vmem>>, vector<1x8x8xf32>,
    return
  }
  func.func @transform_0(%arg0: i32, %arg1: i32) -> (i32, i32, i32) {
    %c0_i32 = arith.constant 0 : i32
    %c0_i32_0 = arith.constant 0 : i32
    return %arg0, %arg1, %c0_i32 : i32, i32, i32
  }
  func.func @transform_1(%arg0: i32, %arg1: i32) -> (i32, i32, i32) {
    %c0_i32 = arith.constant 0 : i32
    %c0_i32_0 = arith.constant 0 : i32
    %c0_i32_1 = arith.constant 0 : i32
    return %arg0, %c0_i32, %c0_i32_0 : i32, i32, i32
  }
  func.func @transform_2(%arg0: i32, %arg1: i32) -> (i32, i32) {
    %c0_i32 = arith.constant 0 : i32
    %c0_i32_0 = arith.constant 0 : i32
    %c0_i32_1 = arith.constant 0 : i32
    return %c0_i32, %c0_i32_0 : i32, i32
  }
  func.func @transform_3(%arg0: i32, %arg1: i32) -> (i32, i32) {
    %c0_i32 = arith.constant 0 : i32
    %c0_i32_0 = arith.constant 0 : i32
    %c0_i32_1 = arith.constant 0 : i32
    return %c0_i32, %c0_i32_0 : i32, i32
  }
  func.func @transform_4(%arg0: i32, %arg1: i32) -> (i32, i32, i32) {
    %c0_i32 = arith.constant 0 : i32
    %c0_i32_0 = arith.constant 0 : i32
    return %arg0, %arg1, %c0_i32 : i32, i32, i32
  }
  func.func @transform_5(%arg0: i32, %arg1: i32) -> (i32, i32, i32) {
    %c0_i32 = arith.constant 0 : i32
    %c0_i32_0 = arith.constant 0 : i32
    return %arg0, %arg1, %c0_i32 : i32, i32, i32
  }
}

</mosaic_0001>

<bundles_post_ra>
// kernel: tpu_custom_call.1
= control target key start
LH: loop header
LB: loop body
LE: loop exit
PB: predicated region body
PF: predicated region fallthrough
CT: control target
= control target key end

     0   :  { %s1167_s0 = inlined_call_operand.hbm [shape: bf16[2,8,32], index: 0, kind: input, shape index: {}]   ;;  %s1168_s1 = inlined_call_operand.hbm [shape: bf16[2,8,32], index: 1, kind: input, shape index: {}]   ;;  %s1169_s2 = inlined_call_operand.hbm [shape: bf16[32,96], index: 2, kind: input, shape index: {}]   ;;  %s1170_s3 = inlined_call_operand.vmem [shape: f32[1,96], index: 3, kind: input, shape index: {}]   ;;  %s1171_s4 = inlined_call_operand.hbm [shape: f32[2,8,32], index: 4, kind: output, shape index: {0}]   ;;  %s1172_s5 = inlined_call_operand.hbm [shape: f32[2,8,8], index: 5, kind: output, shape index: {1}]  }
   0x1   :  { %1177 = sst [smem:[#allocation21_spill]] %s1169_s2 }
   0x2   :  { %11 = vsyncpa [#allocation3], 0 }
   0x3   :  { %13 = vsyncpa [#allocation3 + $0x1], 0 }
   0x4   :  { %14 = vsyncpa [#allocation6], 0 }
   0x5   :  { %16 = vsyncpa [#allocation6 + $0x1], 0 }
   0x6   :  { %17 = vsyncpa [#allocation4], 0 }
   0x7   :  { %19 = vsyncpa [#allocation4 + $0x1], 0 }
   0x8   :  { %20 = vsyncpa [#allocation10], 0 }
   0x9   :  { %22 = vsyncpa [#allocation10 + $0x1], 0  ;;  %s985_s18 = smov 0   ;;  %s987_s19 = smov 0  }
   0xa   :  { %s989_s20 = smov 0   ;;  %s991_s21 = smov 0  }
   0xb   :  { %s993_s22 = smov 0   ;;  %s995_s23 = smov 0  }
   0xc LB: > { %1178 = sst [smem:[#allocation16_spill]] %s936_s20  ;;  %s1016_s24 = sadd.s32 4294967295, %s948_s23   ;;  %s948_s23 = sphi %s995_s23, %s28_s23   ;;  %s944_s22 = sphi %s993_s22, %s1193_s22   ;;  %s940_s21 = sphi %s991_s21, %s1192_s21   ;;  %s936_s20 = sphi %s989_s20, %s1191_s20   ;;  %s932_s19 = sphi %s987_s19, %s1195_s19   ;;  %s928_s18 = sphi %s985_s18, %s1194_s18  }
   0xd   : > { %1179 = sst [smem:[#allocation17_spill]] %s944_s22  ;;  %p613_p0 = scmp.ge.s32.totalorder %s948_s23, 1 }
   0xe   : > { %p63_p1 = scmp.eq.s32.totalorder %s1016_s24, 0  ;;  %p197_p2 = scmp.lt.s32.totalorder %s948_s23, 3 }
   0xf   : > { %s1180_s2 = sld [smem:[#allocation21_spill]]  ;;  %s950_s29 = smov [#allocation7]  }
  0x10   : > { %p1024_p3 = pnand %p613_p0, %p197_p2  ;;  %s210_s30 = sshll.u32 %s950_s29, 4  ;;  %s211_s30 = int_to_ptr.vmem [resolvable:$true] %s210_s30 }
  0x11   : > { %p615_p6 = scmp.ge.s32.totalorder %s948_s23, 2  ;;  %s951_s6 = smov 64  }
  0x12   : > { %p656_p4 = pneg %p1024_p3  ;;  %s952_s7 = smov 4  }
  0x13   : > { %s612_s8 = sadd.s32 4294967294, %s948_s23   ;;  %s40_s9 = sadd.s32 1, %s944_s22 }
  0x14   : > { %p657_p5 = pnand %p656_p4, %p63_p1  ;;  %s49_s10 = sadd.s32 1, %s936_s20 }
  0x15   : > { %s208_s27 = sshll.u32 %s1180_s2, 4  ;;  %p42_p7 = scmp.ge.s32.totalorder %s40_s9, 2  ;;  %s209_s27 = int_to_ptr.hbm [resolvable:$true] %s208_s27 }
  0x16   : > { %659 = dma.hbm_to_vmem [thread:$0]  (!%p657_p5), %s209_s27, 256, %s211_s30, [#allocation6], %s951_s6, %s951_s6, %s952_s7  }
  0x17   : > { %p56_p8 = scmp.ne.s32.totalorder %s936_s20, %s932_s19  ;;  %p57_p9 = scmp.eq.s32.totalorder %s948_s23, 0 }
  0x18   : > { %p62_p10 = scmp.ne.s32.totalorder %s932_s19, %s928_s18  ;;  %s1197_s9 = smov (%p42_p7, %s40_s9), 0 }
  0x19   : > { %1182 = sst [smem:[#allocation18_spill]] %s1197_s9  ;;  %p1043_p11 = por %p57_p9, %p56_p8 }
  0x1a   : > { %p1049_p12 = por %p63_p1, %p62_p10  ;;  %s44_s13 = ssub.s32 %s944_s22, %s1197_s9 }
  0x1b   : > { %p156_p13 = scmp.eq.s32.totalorder %s1016_s24, 1  ;;  %p47_p0 = scmp.eq.s32.totalorder %s44_s13, 0 }
  0x1c   : > { %p162_p2 = scmp.eq.s32.totalorder %s612_s8, 1  ;;  %p675_p5 = scmp.lt.s32.totalorder %s948_s23, 2 }
  0x1d   : > { %p1056_p4 = por %p156_p13, %p56_p8  ;;  %s227_s17 = sand.u32 1, %s936_s20  }
  0x1e   : > { %s1062_s15 = scalar_select %p47_p0, %s936_s20, %s49_s10  }
  0x1f   : > { %p1064_p7 = por %p162_p2, %p62_p10  ;;  %s616_s25 = sshll.u32 %s227_s17, 2 }
  0x20   : > { %1186 = sst [smem:[#allocation19_spill]] %s1062_s15  ;;  %s617_s26 = sshll.u32 %s944_s22, 2 }
  0x21   : > { %s1187_s16 = scalar_select %p1064_p7, 1, 0 }
  0x22   : > { %s236_s30 = scalar_lea.hbm %s1167_s0, %s617_s26  ;;  %s231_s6 = scalar_lea.vmem [#allocation2], %s616_s25 }
  0x23   : > { %1188 = sst [smem:[#allocation20_spill]] %s1187_s16  ;;  %s240_s7 = sshll.u32 %s231_s6, 4  ;;  %s241_s7 = int_to_ptr.vmem [resolvable:$true] %s240_s7 }
  0x24   : > { %s238_s8 = sshll.u32 %s236_s30, 4  ;;  %p661_p8 = pnand %p675_p5, %p1043_p11  ;;  %s239_s8 = int_to_ptr.hbm [resolvable:$true] %s238_s8 }
  0x25   : > { %s255_s2 = scalar_lea.hbm %s1168_s1, %s617_s26  ;;  %s247_s9 = sand.u32 1, %s948_s23  }
  0x26   : > { %s228_s15 = scalar_lea.sflag [#allocation3], %s227_s17  ;;  %s257_s20 = sshll.u32 %s255_s2, 4  ;;  %s258_s20 = int_to_ptr.hbm [resolvable:$true] %s257_s20 }
  0x27   : > { %663 = dma.hbm_to_vmem [thread:$0]  (!%p661_p8), %s239_s8, 64, %s241_s7, %s228_s15  }
  0x28   : > { %s251_s22 = scalar_lea.vmem [#allocation5], %s616_s25  ;;  %s248_s27 = scalar_lea.sflag [#allocation6], %s247_s9 }
  0x29   : > { %s259_s16 = sshll.u32 %s251_s22, 4  ;;  %268 = sbr.rel (%p1024_p3) target bundleno = 852 (0x354), region = 36  ;;  %s260_s16 = int_to_ptr.vmem [resolvable:$true] %s259_s16 }
  0x2a   : > { %666 = dma.hbm_to_vmem [thread:$0]  (!%p661_p8), %s258_s20, 64, %s260_s16, %s248_s27  }
  0x2b   : > { %s1082_s11 = sand.u32 (!%p1024_p3), 1, %s932_s19  }
  0x2c   : > { %s621_s26 = sshll.u32 (!%p1024_p3), %s1082_s11, 2  ;;  %s271_s29 = scalar_lea.sflag (!%p1024_p3), [#allocation3], %s1082_s11 }
  0x2d   : > { %s274_s17 = scalar_lea.vmem (!%p1024_p3), [#allocation2], %s621_s26 }
  0x2e   : > { %907 = dma.done.wait (%p1049_p12), %s271_s29, 64  }
  0x2f   : > { %909 = vsyncadd (%p1049_p12), %s271_s29, 4294967232  ;;  %s280_s2 = sand.u32 1, %s1016_s24  }
  0x30   : > { %s281_s20 = scalar_lea.sflag [#allocation6], %s280_s2 }
  0x31   : > { %911 = dma.done.wait (%p1049_p12), %s281_s20, 64  }
  0x32   : > { %913 = vsyncadd (%p1049_p12), %s281_s20, 4294967232 }
  0x33   : > { %915 = dma.done.wait (%p63_p1), [#allocation6], 256  }
  0x34   : > { %917 = vsyncadd (%p63_p1), [#allocation6], 4294967040  ;;  %v643_v0 = vld [vmem:[#allocation7 + $0x8] sm:$0xff]  ;;  %v642_v1 = vld [vmem:[#allocation7] sm:$0xff]  ;;  %vm349_vm0 = vcmask 261120   ;;  %s953_s9 = smov 96  }
  0x35   : > { %359 = vmatpush.bf16.msra.mxu0 %v643_v0  ;;  %v328_v2 = vld [vmem:[%s274_s17] sm:$0xf]  ;;  %vm391_vm1 = vcmask 64512   ;;  %s954_s24 = smov 64   ;;  %s623_s12 = sshll.u32 %s1082_s11, 3  ;;  %vm409_vm2 = vcmask 1043456  }
  0x36   : > { %v731_v3 = vld [vmem:[%s1170_s3] ss:$0 sm:$0xff]  ;;  %s326_s15 = scalar_lea.vmem [#allocation9], %s623_s12  ;;  %s638_s16 = sshll.u32 %s940_s21, 3 }
  0x37   : > { %s460_s6 = scalar_lea.hbm %s1172_s5, %s638_s16  ;;  %s462_s7 = sshll.u32 %s326_s15, 4  ;;  %s463_s7 = int_to_ptr.vmem [resolvable:$true] %s462_s7 }
  0x38   : > { %s464_s8 = sshll.u32 %s460_s6, 4  ;;  %s434_s10 = scalar_lea.sflag [#allocation10], %s1082_s11  ;;  %s465_s8 = int_to_ptr.hbm [resolvable:$true] %s464_s8 }
  0x39   : > { %360 = vmatpush.bf16.msra.mxu0 %v642_v1  ;;  %s840_s13 = sshra.s32 %s465_s8, 4  ;;  %s846_s21 = scalar_lea.hbm %s1172_s5, 16  ;;  %s841_s13 = int_to_ptr.hbm [resolvable:$true] %s840_s13 }
  0x3a   : > { %s842_s27 = scalar_lea.hbm %s841_s13, 8  ;;  %p847_p10 = scmp.lt.s32.totalorder %s841_s13, %s1172_s5 }
  0x3b   : > { %p843_p1 = scmp.ne.s32.totalorder %s841_s13, %s842_s27  ;;  %p848_p11 = scmp.lt.s32.totalorder %s846_s21, %s842_s27 }
  0x3c   : > { %633 = vmatmul.msk.bf16.vlgmr.msra.gmra.mxu0 %vm349_vm0, %v328_v2 }
  0x3d   : > { %p844_p3 = pnand %p843_p1, %p1056_p4  ;;  %p849_p12 = por %p848_p11, %p847_p10 }
  0x3f   : > { %p845_p9 = pneg %p844_p3 }
  0x41   : > { %p850_p13 = pnand %p849_p12, %p845_p9 }
  0xb9   : > { %v362_v4 = vpop.f32.mrf.mxu0 }
  0xba   : > { %v363_v5 = vadd.f32 %v731_v3, %v362_v4 }
  0xbc   : > { %v368_v6 = vpack.c.bf16 %v363_v5, %v363_v5  ;;  %v366_v10 = vmul.f32 0.17677669, %v363_v5 }
  0xbe   : > { %370 = vrot.lane.b32.xlu0 %v368_v6, %s953_s9  ;;  %v367_v11 = vpack.c.bf16 %v366_v10, %v366_v10 }
  0xc1   : > { %v364_v7 = vpop.f32.mrf.mxu0 }
 0x130   : > { %v371_v8 = vpop.permute.xlu0 %370 }
 0x131   : > { %v376_v9 = vsel %vm349_vm0, %v371_v8, 0 }
 0x132   : > { %385 = vmatpush.bf16.xpose.msra.mxu1 %v376_v9 }
 0x139   : > { %634 = vmatmul.msk.bf16.vlgmr.msra.gmra.mxu1 %vm349_vm0, %v367_v11 }
 0x1b6   : > { %v387_v12 = vpop.f32.mrf.mxu1 }
 0x1b7   : > { %v392_v13 = vsel %vm391_vm1, %v387_v12, -inf }
 0x1b8   : > { %393 = vmax.xlane.f32.xlu0 %v392_v13 }
 0x1be   : > { %v389_v14 = vpop.f32.mrf.mxu1 }
 0x22b   : > { %v394_v15 = vpop.xlane.xlu0 %393 }
 0x22c   : > { %v395_v16 = vsub.f32 %v387_v12, %v394_v15 }
 0x22e   : > { %v396_v17 = vmul.f32 1.442695, %v395_v16 }
 0x230   : > { %732 = vpow2.f32 %v396_v17 }
 0x236   : > { %v733_v18 = vpop.eup %732 }
 0x237   : > { %v398_v19 = vsel %vm391_vm1, %v733_v18, 0.0 }
 0x238   : > { %399 = vadd.xlane.f32.xlu1 %v398_v19 }
 0x251   : > { %404 = vrot.lane.b32.xlu1 %v368_v6, %s954_s24 }
 0x2ab   : > { %v400_v20 = vpop.xlane.xlu1 %399 }
 0x2ac   : > { %734 = vrcp.f32 %v400_v20 }
 0x2b2   : > { %v735_v21 = vpop.eup %734 }
 0x2b3   : > { %v402_v22 = vmul.f32 %v735_v21, %v733_v18 }
 0x2b5   : > { %427 = vst.msk [vmem:[%s326_s15] sm:$0xff] %vm391_vm1, %v402_v22  ;;  %v403_v25 = vpack.c.bf16 %v402_v22, %v402_v22 }
 0x2c3   : > { %v405_v23 = vpop.permute.xlu1 %404 }
 0x2c4   : > { %v411_v24 = vsel %vm409_vm2, %v405_v23, 0 }
 0x2c5   : > { %420 = vmatpush.bf16.msra.mxu2 %v411_v24 }
 0x2c8   : > { %635 = vmatmul.msk.bf16.vlgmr.msra.gmra.mxu2 %vm391_vm1, %v403_v25 }
 0x2c9   : > { %853 = shalt.err (!%p850_p13)
}
 0x2ca   : > { %653 = dma.vmem_to_hbm [thread:$0]  (%p1056_p4), %s463_s7, 128, %s465_s8, %s434_s10  }
 0x2cb   : > { %s445_s28 = scalar_lea.hbm %s1171_s4, %s638_s16  ;;  %s319_s9 = scalar_lea.vmem [#allocation8], %s623_s12 }
 0x2cc   : > { %s447_s24 = sshll.u32 %s319_s9, 4  ;;  %s449_s15 = sshll.u32 %s445_s28, 4  ;;  %s448_s24 = int_to_ptr.vmem [resolvable:$true] %s447_s24  ;;  %s450_s15 = int_to_ptr.hbm [resolvable:$true] %s449_s15 }
 0x2cd   : > { %s429_s25 = scalar_lea.sflag [#allocation4], %s1082_s11  ;;  %s868_s30 = sshra.s32 %s450_s15, 4  ;;  %s869_s30 = int_to_ptr.hbm [resolvable:$true] %s868_s30 }
 0x2ce   : > { %s870_s6 = scalar_lea.hbm %s869_s30, 8  ;;  %s874_s16 = scalar_lea.hbm %s1171_s4, 16 }
 0x2cf   : > { %p871_p0 = scmp.ne.s32.totalorder %s869_s30, %s870_s6  ;;  %p875_p8 = scmp.lt.s32.totalorder %s869_s30, %s1171_s4 }
 0x2d0   : > { %p876_p1 = scmp.lt.s32.totalorder %s874_s16, %s870_s6 }
 0x2d1   : > { %p872_p2 = pnand %p871_p0, %p1056_p4 }
 0x2d2   : > { %p877_p3 = por %p876_p1, %p875_p8 }
 0x2d3   : > { %p873_p5 = pneg %p872_p2 }
 0x2d5   : > { %p878_p9 = pnand %p877_p3, %p873_p5 }
 0x34b   : > { %v422_v26 = vpop.f32.mrf.mxu2 }
 0x34c   : > { %426 = vst.msk [vmem:[%s319_s9] sm:$0xff] %vm349_vm0, %v422_v26 }
 0x34d   : > { %881 = shalt.err (!%p878_p9)
}
 0x34e   : > { %652 = dma.vmem_to_hbm [thread:$0]  (%p1056_p4), %s448_s24, 128, %s450_s15, %s429_s25  }
 0x353   : > { %v424_v27 = vpop.f32.mrf.mxu2 }
 0x354 PF: > { %s476_s13 = sand.u32 1, %s928_s18   ;;  %p668_p10 = pnand %p615_p6, %p1064_p7 }
 0x355   : > { %s477_s27 = scalar_lea.sflag [#allocation4], %s476_s13 }
 0x356   : > { %p669_p11 = pneg %p668_p10 }
 0x358   : > { %919 = dma.done.wait (%p669_p11), %s477_s27, 128  }
 0x359   : > { %921 = vsyncadd (%p669_p11), %s477_s27, 4294967168  ;;  %s487_s26 = scalar_lea.sflag [#allocation10], %s476_s13 }
 0x35a   : > { %923 = dma.done.wait (%p669_p11), %s487_s26, 128  }
 0x35b   : > { %925 = vsyncadd (%p669_p11), %s487_s26, 4294967168  ;;  %s28_s23 = sadd.s32 1, %s948_s23   ;;  %s1190_s14 = sld [smem:[#allocation16_spill]] }
 0x35c   : > { %p25_p12 = scmp.ge.s32.totalorder %s28_s23, 4   ;;  %s1191_s20 = sld [smem:[#allocation19_spill]] }
 0x35d   : > { %s1192_s21 = sld [smem:[#allocation17_spill]]  ;;  %s1194_s18 = smov %s932_s19 }
 0x35e   : > { %s1193_s22 = sld [smem:[#allocation18_spill]]  ;;  %27 = sbr.rel (!%p25_p12) target bundleno = 12 (0xc), region = 115 }
 0x361   : > { %s1195_s19 = smov %s1190_s14 }
 0x363   :  { %493 = vsyncpa [#allocation3], 1 }
 0x364   :  { %495 = vsyncpa [#allocation3 + $0x1], 1 }
 0x365   :  { %496 = vsyncpa [#allocation6], 1 }
 0x366   :  { %498 = vsyncpa [#allocation6 + $0x1], 1 }
 0x367   :  { %499 = vsyncpa [#allocation4], 1 }
 0x368   :  { %501 = vsyncpa [#allocation4 + $0x1], 1 }
 0x369   :  { %502 = vsyncpa [#allocation10], 1 }
 0x36a   :  { %504 = vsyncpa [#allocation10 + $0x1], 1 }

</bundles_post_ra>
